<compile_context>
chip_gen: v5e
topology: v5e:2x2
jax: 0.10.0
libtpu: 0.0.40
codegen_flags: <defaults>
</compile_context>

<pallas_src>
import functools
import numpy as np

import jax
import jax.numpy as jnp
from jax.experimental import pallas as pl
from jax.experimental.pallas import tpu as pltpu


# ----------------------- schedule (glue, matches torch) -----------------------
def linear_beta_schedule(timesteps: int) -> np.ndarray:
    scale = 1000.0 / timesteps
    beta_start = scale * 0.0001
    beta_end = scale * 0.02
    return np.linspace(beta_start, beta_end, timesteps, dtype=np.float64)


# ------------------------------- Pallas kernel --------------------------------
def _diffusion_kernel(scal_ref,       # SMEM (B, 3): [sqrt(ab_t), sqrt(1-ab_t), t/T]
                      cond_ref,       # VMEM (B, Dc)
                      x0_ref,         # VMEM (B, C, HW)   lane-dense (HW in lanes)
                      eps_ref,        # VMEM (B, C, HW)
                      w_conv_ref,     # VMEM (C, C)       rows = out-ch, cols = in-ch
                      b_conv_ref,     # VMEM (C, 1)
                      w_cond_t_ref,   # VMEM (C, Dc)      == w_cond.T
                      w_t_ref,        # VMEM (C, 1)
                      out_ref,        # VMEM (B, C, HW)   model_output
                      loss_ref,       # VMEM (1, 1)       scalar MSE
                      *, numel):
    B, C, HW = x0_ref.shape

    # Small parameters: load once, hoisted out of the (unrolled) batch loop.
    w_conv = w_conv_ref[...]        # (C, C)
    b_conv = b_conv_ref[...]        # (C, 1)
    w_cond_t = w_cond_t_ref[...]    # (C, Dc)
    w_t = w_t_ref[...]              # (C, 1)
    cond = cond_ref[...]            # (B, Dc)

    inv_numel = 1.0 / numel
    loss_acc = jnp.zeros((1, 1), jnp.float32)

    # B is tiny and static -> Python-unrolled; single grid step overall.
    for b in range(B):
        a = scal_ref[b, 0]          # sqrt(alpha_bar_t[b])
        s = scal_ref[b, 1]          # sqrt(1 - alpha_bar_t[b])
        tn = scal_ref[b, 2]         # t[b] / num_timesteps

        x0 = x0_ref[b]              # (C, HW)
        eps = eps_ref[b]            # (C, HW)

        # q_sample: xt = sqrt(alpha_bar_t) * x0 + sqrt(1 - alpha_bar_t) * eps
        xt = a * x0 + s * eps

        # 1x1 conv channel mix on the VPU (no MXU): y[o,:] = sum_c W[o,c]*xt[c,:]
        mix = w_conv[:, 0:1] * xt[0:1, :]                      # (C,1)*(1,HW) -> (C,HW)
        for c in range(1, C):
            mix = mix + w_conv[:, c:c + 1] * xt[c:c + 1, :]

        # cond embedding for this batch row: (1,Dc)*(C,Dc) -> lane reduce -> (C,1)
        cond_row = cond[b:b + 1, :]
        cond_emb = jnp.sum(cond_row * w_cond_t, axis=1, keepdims=True)

        # time embedding + bias (all (C,1), broadcast over the HW lanes)
        add = b_conv + cond_emb + tn * w_t
        y = mix + add                                          # (C, HW)

        out_ref[b] = y.astype(out_ref.dtype)

        # objective == 'pred_noise' -> target = eps ; loss_type == 'L2' -> MSE
        diff = y - eps
        loss_acc = loss_acc + jnp.sum(diff * diff)

    loss_ref[...] = loss_acc * inv_numel


# ------------------------------- JAX wrapper -----------------------------------
def gaussian_diffusion_forward(x0_nchw, eps_nchw, t, cond, params, schedule):
    """Returns (model_output [B,C,H,W], scalar MSE loss) — mirrors p_losses()."""
    B, C, H, W = x0_nchw.shape
    HW = H * W
    Dc = cond.shape[1]
    sqrt_ab, sqrt_1m_ab = schedule
    T = sqrt_ab.shape[0]

    # extract(): per-batch schedule scalars (tiny gather, glue)
    a = sqrt_ab[t]
    s = sqrt_1m_ab[t]
    t_norm = t.astype(jnp.float32) / float(T)
    scalars = jnp.stack([a, s, t_norm], axis=1).astype(jnp.float32)      # (B, 3)

    # lane-dense layout: NCHW -> (B, C, H*W); a free reshape, no transposes.
    # (v6e/v7x: x0/eps could be passed as bf16 here for ~2x less HBM traffic;
    #  kept f32 so the same script is also optimal on v5e.)
    x0 = x0_nchw.reshape(B, C, HW)
    eps = eps_nchw.reshape(B, C, HW)

    w_conv = params["w_conv"]                                            # (C, C)
    b_conv = params["b_conv"].reshape(C, 1)                              # (C, 1)
    w_cond_t = params["w_cond"].T                                        # (C, Dc)
    w_t = params["w_t"].reshape(C, 1)                                    # (C, 1)

    numel = float(B * C * H * W)
    kernel = functools.partial(_diffusion_kernel, numel=numel)

    # Whole problem fits in VMEM -> single invocation (no grid).
    # TODO(synk): for real image sizes, tile the HW axis with a BlockSpec grid
    # (biggest block that fits the scoped VMEM limit, esp. v7x's 64 MiB) and
    # emit per-block partial loss sums to enable 'parallel' across v7x's 2 TCs.
    out_bch, loss = pl.pallas_call(
        kernel,
        out_shape=(
            jax.ShapeDtypeStruct((B, C, HW), jnp.float32),
            jax.ShapeDtypeStruct((1, 1), jnp.float32),
        ),
        in_specs=[
            pl.BlockSpec(memory_space=pltpu.MemorySpace.SMEM),           # scalars (B,3)
            pl.BlockSpec(memory_space=pltpu.MemorySpace.VMEM),           # cond
            pl.BlockSpec(memory_space=pltpu.MemorySpace.VMEM),           # x0
            pl.BlockSpec(memory_space=pltpu.MemorySpace.VMEM),           # eps
            pl.BlockSpec(memory_space=pltpu.MemorySpace.VMEM),           # w_conv
            pl.BlockSpec(memory_space=pltpu.MemorySpace.VMEM),           # b_conv
            pl.BlockSpec(memory_space=pltpu.MemorySpace.VMEM),           # w_cond.T
            pl.BlockSpec(memory_space=pltpu.MemorySpace.VMEM),           # w_t
        ],
        out_specs=(
            pl.BlockSpec(memory_space=pltpu.MemorySpace.VMEM),           # model_output
            pl.BlockSpec(memory_space=pltpu.MemorySpace.VMEM),           # loss
        ),
    )(scalars, cond, x0, eps, w_conv, b_conv, w_cond_t, w_t)

    model_output = out_bch.reshape(B, C, H, W)
    return model_output, loss[0, 0]


# ------------------------------ pure-JAX reference ------------------------------
def reference_forward(x0, eps, t, cond, params, schedule):
    B, C, H, W = x0.shape
    sqrt_ab, sqrt_1m_ab = schedule
    T = sqrt_ab.shape[0]
    a = sqrt_ab[t][:, None, None, None]
    s = sqrt_1m_ab[t][:, None, None, None]
    xt = a * x0 + s * eps
    y = jnp.einsum("oc,bchw->bohw", params["w_conv"], xt)
    y = y + params["b_conv"].reshape(1, C, 1, 1)
    cond_emb = cond @ params["w_cond"]                                   # (B, C)
    t_emb = (t.astype(jnp.float32) / float(T))[:, None] * params["w_t"][0][None, :]
    y = y + (cond_emb + t_emb)[:, :, None, None]
    loss = jnp.mean((y - eps) ** 2)
    return y, loss


if __name__ == "__main__":
    B, C, H, W = 2, 4, 16, 16
    Dc = 8
    timesteps = 1000

    # diffusion schedule buffers (float64 -> float32, as in the torch module)
    betas = linear_beta_schedule(timesteps)
    alphas = 1.0 - betas
    alpha_bar = np.cumprod(alphas)
    sqrt_ab = jnp.asarray(np.sqrt(alpha_bar), dtype=jnp.float32)
    sqrt_1m_ab = jnp.asarray(np.sqrt(1.0 - alpha_bar), dtype=jnp.float32)
    schedule = (sqrt_ab, sqrt_1m_ab)

    key = jax.random.PRNGKey(0)
    k_x0, k_eps, k_cond, k_t, k_w, k_b, k_wc, k_wt = jax.random.split(key, 8)

    x0 = jax.random.normal(k_x0, (B, C, H, W), dtype=jnp.float32)
    eps = jax.random.normal(k_eps, (B, C, H, W), dtype=jnp.float32)
    cond = jax.random.normal(k_cond, (B, Dc), dtype=jnp.float32)
    t = jax.random.randint(k_t, (B,), 0, timesteps)

    params = {
        "w_conv": 0.3 * jax.random.normal(k_w, (C, C), dtype=jnp.float32),
        "b_conv": 0.1 * jax.random.normal(k_b, (1, C), dtype=jnp.float32),
        "w_cond": 0.2 * jax.random.normal(k_wc, (Dc, C), dtype=jnp.float32),
        "w_t": 0.2 * jax.random.normal(k_wt, (1, C), dtype=jnp.float32),
    }

    model_out, loss = gaussian_diffusion_forward(x0, eps, t, cond, params, schedule)
    jax.block_until_ready((model_out, loss))

    ref_out, ref_loss = reference_forward(x0, eps, t, cond, params, schedule)
    assert jnp.allclose(model_out, ref_out, atol=1e-4, rtol=1e-4), "model_output mismatch"
    assert jnp.allclose(loss, ref_loss, atol=1e-4, rtol=1e-4), "loss mismatch"

    print("KERNEL_OK")
</pallas_src>

<mosaic_0001>
module attributes {stable_mosaic.version = 11 : i64} {
  func.func @_diffusion_kernel(%arg0: memref<2x3xf32, #tpu.memory_space<smem>>, %arg1: memref<2x8xf32, #tpu.memory_space<vmem>>, %arg2: memref<2x4x256xf32, #tpu.memory_space<vmem>>, %arg3: memref<2x4x256xf32, #tpu.memory_space<vmem>>, %arg4: memref<4x4xf32, #tpu.memory_space<vmem>>, %arg5: memref<4x1xf32, #tpu.memory_space<vmem>>, %arg6: memref<4x8xf32, #tpu.memory_space<vmem>>, %arg7: memref<4x1xf32, #tpu.memory_space<vmem>>, %arg8: memref<2x4x256xf32, #tpu.memory_space<vmem>>, %arg9: memref<1x1xf32, #tpu.memory_space<vmem>>) attributes {dimension_semantics = [], scalar_prefetch = 0 : i64, scratch_operands = 0 : i64, tpu.core_type = #tpu.core_type<tc>} {
    %c0 = arith.constant 0 : index
    %c0_0 = arith.constant 0 : index
    %0 = vector.load %arg4[%c0, %c0_0] : memref<4x4xf32, #tpu.memory_space<vmem>>, vector<4x4xf32>
    %c0_1 = arith.constant 0 : index
    %c0_2 = arith.constant 0 : index
    %1 = vector.load %arg5[%c0_1, %c0_2] : memref<4x1xf32, #tpu.memory_space<vmem>>, vector<4x1xf32>
    %c0_3 = arith.constant 0 : index
    %c0_4 = arith.constant 0 : index
    %2 = vector.load %arg6[%c0_3, %c0_4] : memref<4x8xf32, #tpu.memory_space<vmem>>, vector<4x8xf32>
    %c0_5 = arith.constant 0 : index
    %c0_6 = arith.constant 0 : index
    %3 = vector.load %arg7[%c0_5, %c0_6] : memref<4x1xf32, #tpu.memory_space<vmem>>, vector<4x1xf32>
    %c0_7 = arith.constant 0 : index
    %c0_8 = arith.constant 0 : index
    %4 = vector.load %arg1[%c0_7, %c0_8] : memref<2x8xf32, #tpu.memory_space<vmem>>, vector<2x8xf32>
    %cst = arith.constant 0.000000e+00 : f32
    %5 = vector.broadcast %cst : f32 to vector<1x1xf32>
    %c0_9 = arith.constant 0 : index
    %c0_10 = arith.constant 0 : index
    %6 = memref.load %arg0[%c0_9, %c0_10] : memref<2x3xf32, #tpu.memory_space<smem>>
    %c0_11 = arith.constant 0 : index
    %c1 = arith.constant 1 : index
    %7 = memref.load %arg0[%c0_11, %c1] : memref<2x3xf32, #tpu.memory_space<smem>>
    %c0_12 = arith.constant 0 : index
    %c2 = arith.constant 2 : index
    %8 = memref.load %arg0[%c0_12, %c2] : memref<2x3xf32, #tpu.memory_space<smem>>
    %c0_13 = arith.constant 0 : index
    %c0_14 = arith.constant 0 : index
    %c0_15 = arith.constant 0 : index
    %9 = vector.load %arg2[%c0_13, %c0_14, %c0_15] : memref<2x4x256xf32, #tpu.memory_space<vmem>>, vector<1x4x256xf32>
    %10 = vector.shape_cast %9 : vector<1x4x256xf32> to vector<4x256xf32>
    %c0_16 = arith.constant 0 : index
    %c0_17 = arith.constant 0 : index
    %c0_18 = arith.constant 0 : index
    %11 = vector.load %arg3[%c0_16, %c0_17, %c0_18] : memref<2x4x256xf32, #tpu.memory_space<vmem>>, vector<1x4x256xf32>
    %12 = vector.shape_cast %11 : vector<1x4x256xf32> to vector<4x256xf32>
    %13 = vector.broadcast %6 : f32 to vector<4x256xf32>
    %14 = arith.mulf %13, %10 : vector<4x256xf32>
    %15 = vector.broadcast %7 : f32 to vector<4x256xf32>
    %16 = arith.mulf %15, %12 : vector<4x256xf32>
    %17 = arith.addf %14, %16 : vector<4x256xf32>
    %18 = vector.extract_strided_slice %0 {offsets = [0, 0], sizes = [4, 1], strides = [1, 1]} : vector<4x4xf32> to vector<4x1xf32>
    %19 = vector.extract_strided_slice %17 {offsets = [0, 0], sizes = [1, 256], strides = [1, 1]} : vector<4x256xf32> to vector<1x256xf32>
    %20 = vector.broadcast %18 : vector<4x1xf32> to vector<4x256xf32>
    %21 = vector.broadcast %19 : vector<1x256xf32> to vector<4x256xf32>
    %22 = arith.mulf %20, %21 : vector<4x256xf32>
    %23 = vector.extract_strided_slice %0 {offsets = [0, 1], sizes = [4, 1], strides = [1, 1]} : vector<4x4xf32> to vector<4x1xf32>
    %24 = vector.extract_strided_slice %17 {offsets = [1, 0], sizes = [1, 256], strides = [1, 1]} : vector<4x256xf32> to vector<1x256xf32>
    %25 = vector.broadcast %23 : vector<4x1xf32> to vector<4x256xf32>
    %26 = vector.broadcast %24 : vector<1x256xf32> to vector<4x256xf32>
    %27 = arith.mulf %25, %26 : vector<4x256xf32>
    %28 = arith.addf %22, %27 : vector<4x256xf32>
    %29 = vector.extract_strided_slice %0 {offsets = [0, 2], sizes = [4, 1], strides = [1, 1]} : vector<4x4xf32> to vector<4x1xf32>
    %30 = vector.extract_strided_slice %17 {offsets = [2, 0], sizes = [1, 256], strides = [1, 1]} : vector<4x256xf32> to vector<1x256xf32>
    %31 = vector.broadcast %29 : vector<4x1xf32> to vector<4x256xf32>
    %32 = vector.broadcast %30 : vector<1x256xf32> to vector<4x256xf32>
    %33 = arith.mulf %31, %32 : vector<4x256xf32>
    %34 = arith.addf %28, %33 : vector<4x256xf32>
    %35 = vector.extract_strided_slice %0 {offsets = [0, 3], sizes = [4, 1], strides = [1, 1]} : vector<4x4xf32> to vector<4x1xf32>
    %36 = vector.extract_strided_slice %17 {offsets = [3, 0], sizes = [1, 256], strides = [1, 1]} : vector<4x256xf32> to vector<1x256xf32>
    %37 = vector.broadcast %35 : vector<4x1xf32> to vector<4x256xf32>
    %38 = vector.broadcast %36 : vector<1x256xf32> to vector<4x256xf32>
    %39 = arith.mulf %37, %38 : vector<4x256xf32>
    %40 = arith.addf %34, %39 : vector<4x256xf32>
    %41 = vector.extract_strided_slice %4 {offsets = [0, 0], sizes = [1, 8], strides = [1, 1]} : vector<2x8xf32> to vector<1x8xf32>
    %42 = vector.broadcast %41 : vector<1x8xf32> to vector<4x8xf32>
    %43 = arith.mulf %42, %2 : vector<4x8xf32>
    %cst_19 = arith.constant dense<0.000000e+00> : vector<4xf32>
    %44 = vector.multi_reduction <add>, %43, %cst_19 [1] : vector<4x8xf32> to vector<4xf32>
    %45 = vector.shape_cast %44 : vector<4xf32> to vector<4x1xf32>
    %46 = arith.addf %1, %45 : vector<4x1xf32>
    %47 = vector.broadcast %8 : f32 to vector<4x1xf32>
    %48 = arith.mulf %47, %3 : vector<4x1xf32>
    %49 = arith.addf %46, %48 : vector<4x1xf32>
    %50 = vector.broadcast %49 : vector<4x1xf32> to vector<4x256xf32>
    %51 = arith.addf %40, %50 : vector<4x256xf32>
    %c0_20 = arith.constant 0 : index
    %c0_21 = arith.constant 0 : index
    %c0_22 = arith.constant 0 : index
    %52 = vector.load %arg8[%c0_20, %c0_21, %c0_22] : memref<2x4x256xf32, #tpu.memory_space<vmem>>, vector<1x4x256xf32>
    %53 = vector.shape_cast %52 : vector<1x4x256xf32> to vector<4x256xf32>
    %54 = vector.shape_cast %51 : vector<4x256xf32> to vector<1x4x256xf32>
    tpu.vector_store %arg8[%c0_20, %c0_21, %c0_22], %54 {strides = array<i32>} : memref<2x4x256xf32, #tpu.memory_space<vmem>>, vector<1x4x256xf32>,
    %55 = arith.subf %51, %12 : vector<4x256xf32>
    %56 = arith.mulf %55, %55 : vector<4x256xf32>
    %57 = vector.shape_cast %56 : vector<4x256xf32> to vector<1x4x256xf32>
    %cst_23 = arith.constant dense<0.000000e+00> : vector<1xf32>
    %58 = vector.multi_reduction <add>, %57, %cst_23 [1, 2] : vector<1x4x256xf32> to vector<1xf32>
    %59 = vector.shape_cast %58 : vector<1xf32> to vector<1x1x1xf32>
    %60 = vector.extract %59[0, 0, 0] : f32 from vector<1x1x1xf32>
    %61 = vector.broadcast %60 : f32 to vector<1x1xf32>
    %62 = arith.addf %5, %61 : vector<1x1xf32>
    %c1_24 = arith.constant 1 : index
    %c0_25 = arith.constant 0 : index
    %63 = memref.load %arg0[%c1_24, %c0_25] : memref<2x3xf32, #tpu.memory_space<smem>>
    %c1_26 = arith.constant 1 : index
    %c1_27 = arith.constant 1 : index
    %64 = memref.load %arg0[%c1_26, %c1_27] : memref<2x3xf32, #tpu.memory_space<smem>>
    %c1_28 = arith.constant 1 : index
    %c2_29 = arith.constant 2 : index
    %65 = memref.load %arg0[%c1_28, %c2_29] : memref<2x3xf32, #tpu.memory_space<smem>>
    %c1_30 = arith.constant 1 : index
    %c0_31 = arith.constant 0 : index
    %c0_32 = arith.constant 0 : index
    %66 = vector.load %arg2[%c1_30, %c0_31, %c0_32] : memref<2x4x256xf32, #tpu.memory_space<vmem>>, vector<1x4x256xf32>
    %67 = vector.shape_cast %66 : vector<1x4x256xf32> to vector<4x256xf32>
    %c1_33 = arith.constant 1 : index
    %c0_34 = arith.constant 0 : index
    %c0_35 = arith.constant 0 : index
    %68 = vector.load %arg3[%c1_33, %c0_34, %c0_35] : memref<2x4x256xf32, #tpu.memory_space<vmem>>, vector<1x4x256xf32>
    %69 = vector.shape_cast %68 : vector<1x4x256xf32> to vector<4x256xf32>
    %70 = vector.broadcast %63 : f32 to vector<4x256xf32>
    %71 = arith.mulf %70, %67 : vector<4x256xf32>
    %72 = vector.broadcast %64 : f32 to vector<4x256xf32>
    %73 = arith.mulf %72, %69 : vector<4x256xf32>
    %74 = arith.addf %71, %73 : vector<4x256xf32>
    %75 = vector.extract_strided_slice %0 {offsets = [0, 0], sizes = [4, 1], strides = [1, 1]} : vector<4x4xf32> to vector<4x1xf32>
    %76 = vector.extract_strided_slice %74 {offsets = [0, 0], sizes = [1, 256], strides = [1, 1]} : vector<4x256xf32> to vector<1x256xf32>
    %77 = vector.broadcast %75 : vector<4x1xf32> to vector<4x256xf32>
    %78 = vector.broadcast %76 : vector<1x256xf32> to vector<4x256xf32>
    %79 = arith.mulf %77, %78 : vector<4x256xf32>
    %80 = vector.extract_strided_slice %0 {offsets = [0, 1], sizes = [4, 1], strides = [1, 1]} : vector<4x4xf32> to vector<4x1xf32>
    %81 = vector.extract_strided_slice %74 {offsets = [1, 0], sizes = [1, 256], strides = [1, 1]} : vector<4x256xf32> to vector<1x256xf32>
    %82 = vector.broadcast %80 : vector<4x1xf32> to vector<4x256xf32>
    %83 = vector.broadcast %81 : vector<1x256xf32> to vector<4x256xf32>
    %84 = arith.mulf %82, %83 : vector<4x256xf32>
    %85 = arith.addf %79, %84 : vector<4x256xf32>
    %86 = vector.extract_strided_slice %0 {offsets = [0, 2], sizes = [4, 1], strides = [1, 1]} : vector<4x4xf32> to vector<4x1xf32>
    %87 = vector.extract_strided_slice %74 {offsets = [2, 0], sizes = [1, 256], strides = [1, 1]} : vector<4x256xf32> to vector<1x256xf32>
    %88 = vector.broadcast %86 : vector<4x1xf32> to vector<4x256xf32>
    %89 = vector.broadcast %87 : vector<1x256xf32> to vector<4x256xf32>
    %90 = arith.mulf %88, %89 : vector<4x256xf32>
    %91 = arith.addf %85, %90 : vector<4x256xf32>
    %92 = vector.extract_strided_slice %0 {offsets = [0, 3], sizes = [4, 1], strides = [1, 1]} : vector<4x4xf32> to vector<4x1xf32>
    %93 = vector.extract_strided_slice %74 {offsets = [3, 0], sizes = [1, 256], strides = [1, 1]} : vector<4x256xf32> to vector<1x256xf32>
    %94 = vector.broadcast %92 : vector<4x1xf32> to vector<4x256xf32>
    %95 = vector.broadcast %93 : vector<1x256xf32> to vector<4x256xf32>
    %96 = arith.mulf %94, %95 : vector<4x256xf32>
    %97 = arith.addf %91, %96 : vector<4x256xf32>
    %98 = vector.extract_strided_slice %4 {offsets = [1, 0], sizes = [1, 8], strides = [1, 1]} : vector<2x8xf32> to vector<1x8xf32>
    %99 = vector.broadcast %98 : vector<1x8xf32> to vector<4x8xf32>
    %100 = arith.mulf %99, %2 : vector<4x8xf32>
    %cst_36 = arith.constant dense<0.000000e+00> : vector<4xf32>
    %101 = vector.multi_reduction <add>, %100, %cst_36 [1] : vector<4x8xf32> to vector<4xf32>
    %102 = vector.shape_cast %101 : vector<4xf32> to vector<4x1xf32>
    %103 = arith.addf %1, %102 : vector<4x1xf32>
    %104 = vector.broadcast %65 : f32 to vector<4x1xf32>
    %105 = arith.mulf %104, %3 : vector<4x1xf32>
    %106 = arith.addf %103, %105 : vector<4x1xf32>
    %107 = vector.broadcast %106 : vector<4x1xf32> to vector<4x256xf32>
    %108 = arith.addf %97, %107 : vector<4x256xf32>
    %c1_37 = arith.constant 1 : index
    %c0_38 = arith.constant 0 : index
    %c0_39 = arith.constant 0 : index
    %109 = vector.load %arg8[%c1_37, %c0_38, %c0_39] : memref<2x4x256xf32, #tpu.memory_space<vmem>>, vector<1x4x256xf32>
    %110 = vector.shape_cast %109 : vector<1x4x256xf32> to vector<4x256xf32>
    %111 = vector.shape_cast %108 : vector<4x256xf32> to vector<1x4x256xf32>
    tpu.vector_store %arg8[%c1_37, %c0_38, %c0_39], %111 {strides = array<i32>} : memref<2x4x256xf32, #tpu.memory_space<vmem>>, vector<1x4x256xf32>,
    %112 = arith.subf %108, %69 : vector<4x256xf32>
    %113 = arith.mulf %112, %112 : vector<4x256xf32>
    %114 = vector.shape_cast %113 : vector<4x256xf32> to vector<1x4x256xf32>
    %cst_40 = arith.constant dense<0.000000e+00> : vector<1xf32>
    %115 = vector.multi_reduction <add>, %114, %cst_40 [1, 2] : vector<1x4x256xf32> to vector<1xf32>
    %116 = vector.shape_cast %115 : vector<1xf32> to vector<1x1x1xf32>
    %117 = vector.extract %116[0, 0, 0] : f32 from vector<1x1x1xf32>
    %118 = vector.broadcast %117 : f32 to vector<1x1xf32>
    %119 = arith.addf %62, %118 : vector<1x1xf32>
    %cst_41 = arith.constant 4.8828125E-4 : f32
    %120 = vector.broadcast %cst_41 : f32 to vector<1x1xf32>
    %121 = arith.mulf %119, %120 : vector<1x1xf32>
    %c0_42 = arith.constant 0 : index
    %c0_43 = arith.constant 0 : index
    %122 = vector.load %arg9[%c0_42, %c0_43] : memref<1x1xf32, #tpu.memory_space<vmem>>, vector<1x1xf32>
    tpu.vector_store %arg9[%c0_42, %c0_43], %121 {strides = array<i32>} : memref<1x1xf32, #tpu.memory_space<vmem>>, vector<1x1xf32>,
    return
  }
}

</mosaic_0001>

<bundles_post_ra>
// kernel: tpu_custom_call.1
= control target key start
LH: loop header
LB: loop body
LE: loop exit
PB: predicated region body
PF: predicated region fallthrough
CT: control target
= control target key end

     0   :  { %15 = vsyncpa [#allocation5], 0  ;;  %s630_s0 = inlined_call_operand.hbm [shape: f32[2,3], index: 0, kind: input, shape index: {}]   ;;  %s631_s1 = inlined_call_operand.hbm [shape: f32[2,8], index: 1, kind: input, shape index: {}]   ;;  %s632_s2 = inlined_call_operand.hbm [shape: f32[2,4,256], index: 2, kind: input, shape index: {}]   ;;  %s633_s3 = inlined_call_operand.hbm [shape: f32[2,4,256], index: 3, kind: input, shape index: {}]   ;;  %s634_s4 = inlined_call_operand.vmem [shape: f32[4,4], index: 4, kind: input, shape index: {}]   ;;  %s635_s5 = inlined_call_operand.vmem [shape: f32[4,1], index: 5, kind: input, shape index: {}]   ;;  %s636_s6 = inlined_call_operand.vmem [shape: f32[4,8], index: 6, kind: input, shape index: {}]   ;;  %s637_s7 = inlined_call_operand.vmem [shape: f32[4,1], index: 7, kind: input, shape index: {}]   ;;  %s638_s8 = inlined_call_operand.hbm [shape: f32[2,4,256], index: 8, kind: output, shape index: {0}]   ;;  %s639_s9 = inlined_call_operand.hbm [shape: f32[1,1], index: 9, kind: output, shape index: {1}]  }
   0x1   :  { %16 = vsyncpa [#allocation3], 0 }
   0x2   :  { %17 = vsyncpa [#allocation8], 0 }
   0x3   :  { %18 = vsyncpa [#allocation4], 0  ;;  %s44_s11 = sshll.u32 %s632_s2, 4  ;;  %s45_s11 = int_to_ptr.hbm [resolvable:$true] %s44_s11 }
   0x4   :  { %19 = vsyncpa [#allocation12], 0  ;;  %s517_s12 = smov [#allocation7]   ;;  %s25_s16 = sshll.u32 %s630_s0, 4  ;;  %s26_s16 = int_to_ptr.hbm [resolvable:$true] %s25_s16 }
   0x5   :  { %s46_s13 = sshll.u32 %s517_s12, 4  ;;  %s518_s17 = smov 128   ;;  %s47_s13 = int_to_ptr.vmem [resolvable:$true] %s46_s13 }
   0x6   :  { %s519_s18 = smov 8   ;;  %s520_s19 = smov [#allocation2]  }
   0x7   :  { %52 = dma.hbm_to_vmem [thread:$0]  %s45_s11, 256, %s47_s13, [#allocation8], %s518_s17, %s518_s17, %s519_s18  }
   0x8   :  { %28 = dma.hbm_to_smem %s26_s16, 32, %s520_s19, [#allocation5]  }
   0x9   :  { %s34_s21 = sshll.u32 %s631_s1, 4  ;;  %s521_s22 = smov [#allocation6]   ;;  %s35_s21 = int_to_ptr.hbm [resolvable:$true] %s34_s21 }
   0xa   :  { %s36_s23 = sshll.u32 %s521_s22, 4  ;;  %s57_s0 = sshll.u32 %s633_s3, 4  ;;  %s37_s23 = int_to_ptr.vmem [resolvable:$true] %s36_s23  ;;  %s58_s0 = int_to_ptr.hbm [resolvable:$true] %s57_s0 }
   0xb   :  { %39 = dma.hbm_to_vmem [thread:$0]  %s35_s21, 32, %s37_s23, [#allocation3]  }
   0xc   :  { %s522_s26 = smov [#allocation9]  }
   0xd   :  { %s59_s27 = sshll.u32 %s522_s26, 4  ;;  %s60_s27 = int_to_ptr.vmem [resolvable:$true] %s59_s27 }
   0xe   :  { %65 = dma.hbm_to_vmem [thread:$0]  %s58_s0, 256, %s60_s27, [#allocation8], %s518_s17, %s518_s17, %s519_s18  }
   0xf   :  { %507 = dma.done.wait [#allocation5], 32  }
  0x10   :  { %508 = vsyncadd [#allocation5], 4294967264 }
  0x11   :  { %509 = dma.done.wait [#allocation3], 32  }
  0x12   :  { %510 = vsyncadd [#allocation3], 4294967264 }
  0x13   :  { %511 = dma.done.wait [#allocation8], 512  }
  0x14   :  { %512 = vsyncadd [#allocation8], 4294966784 }
  0x15   :  { %90 = sfence }
  0x16   :  { %v93_v0 = vld [vmem:[%s636_s6] sm:$0xf]  ;;  %v95_v1 = vld [vmem:[#allocation6] sm:$0x3]  ;;  %v523_v3 = vmov 0   ;;  %vm164_vm0 = vcmask 60416  }
  0x17   :  { %v162_v2 = vperm.slane %v95_v1, 0  ;;  %369 = vset.pattern.permute.xlu1 %v523_v3  ;;  %v91_v4 = vld [vmem:[%s634_s4] sm:$0xf]  ;;  %373 = vset.pattern.permute.xlu0 %v523_v3  ;;  %v261_v6 = vperm.slane %v95_v1, 1  ;;  %v524_v9 = vmov 1   ;;  %v525_v11 = vmov 2  }
  0x18   :  { %108 = vperm.xlu1 %369, %v91_v4   ;;  %371 = vset.pattern.permute.xlu2 %v525_v11  ;;  %v100_v12 = vld [vmem:[#allocation9] sm:$0xff]  ;;  %s349_s4 = sld [smem:[#allocation2 + $0x2]]  ;;  %v526_v13 = vmov 3   ;;  %v216_v27 = vld [vmem:[#allocation9 + $0x8] sm:$0xff]  ;;  %v99_v29 = vld [vmem:[#allocation7] sm:$0xff]  ;;  %vm182_vm1 = vcmask 1043456  }
  0x19   :  { %v163_v5 = vmul.f32 %v162_v2, %v93_v0  ;;  %v262_v8 = vmul.f32 %v261_v6, %v93_v0  ;;  %135 = vperm.xlu2 %371, %v91_v4   ;;  %187 = vst [vmem:[#allocation1] ss:$2 sm:$0xff] %v100_v12  ;;  %v94_v14 = vld [vmem:[%s637_s7] sm:$0xf]  ;;  %s352_s10 = sld [smem:[#allocation2 + $0x82]]  ;;  %v214_v34 = vld [vmem:[#allocation7 + $0x8] sm:$0xff] }
  0x1a   :  { %v92_v16 = vld [vmem:[%s635_s5] sm:$0xf]  ;;  %s96_s7 = sld [smem:[#allocation2]]  ;;  %s317_s19 = sshll.u32 %s638_s8, 4  ;;  %vm309_vm2 = vcmask 0   ;;  %s318_s19 = int_to_ptr.hbm [resolvable:$true] %s317_s19 }
  0x1b   :  { %v165_v7 = vsel %vm164_vm0, %v163_v5, 0.0  ;;  %v263_v10 = vsel %vm164_vm0, %v262_v8, 0.0  ;;  %s348_s13 = sld [smem:[#allocation2 + $0x1]]  ;;  %s527_s20 = smov [#allocation10]  }
  0x1c   :  { %166 = vadd.xlane.f32.xlu0 %v165_v7  ;;  %s350_s5 = sld [smem:[#allocation2 + $0x80]]  ;;  %s315_s2 = sshll.u32 %s527_s20, 4  ;;  %s316_s2 = int_to_ptr.vmem [resolvable:$true] %s315_s2 }
  0x1d   :  { %s351_s14 = sld [smem:[#allocation2 + $0x81]]  ;;  %s331_s24 = sshll.u32 %s639_s9, 4  ;;  %s332_s24 = int_to_ptr.hbm [resolvable:$true] %s331_s24 }
  0x1e   :  { %v169_v15 = vstv %s349_s4 }
  0x1f   :  { %v170_v17 = vmul.f32 %v169_v15, %v94_v14  ;;  %v267_v21 = vstv %s352_s10 }
  0x20   :  { %370 = vset.pattern.permute.xlu1 %v524_v9  ;;  %v268_v22 = vmul.f32 %v267_v21, %v94_v14  ;;  %v609_v26 = vld.sshfl [vmem:[#allocation1] sm:$0xff pattern:$0x75316420]  ;;  %v611_v28 = vld.sshfl [vmem:[#allocation1 + $0x8] sm:$0xff pattern:$0x75316420]  ;;  %v101_v30 = vstv %s96_s7 }
  0x21   :  { %121 = vperm.xlu1 %370, %v91_v4   ;;  %372 = vset.pattern.permute.xlu2 %v526_v13  ;;  %285 = vst [vmem:[#allocation1] ss:$2 sm:$0xff] %v216_v27  ;;  %v103_v31 = vstv %s348_s13  ;;  %v102_v32 = vmul.f32 %v101_v30, %v99_v29 }
  0x22   :  { %149 = vperm.xlu2 %372, %v91_v4   ;;  %v104_v33 = vmul.f32 %v103_v31, %v100_v12  ;;  %v217_v35 = vstv %s350_s5 }
  0x23   :  { %v219_v36 = vstv %s351_s14  ;;  %v218_v39 = vmul.f32 %v217_v35, %v214_v34 }
  0x24   :  { %264 = vadd.xlane.f32.xlu0 %v263_v10  ;;  %v105_v38 = vadd.f32 %v104_v33, %v102_v32  ;;  %v220_v40 = vmul.f32 %v219_v36, %v216_v27 }
  0x26   :  { %v112_v41 = vperm.slane %v105_v38, 0  ;;  %v113_v42 = vperm.slane %v105_v38, 4  ;;  %v124_v43 = vperm.slane %v105_v38, 1  ;;  %v125_v44 = vperm.slane %v105_v38, 5 }
  0x27   :  { %v221_v45 = vadd.f32 %v220_v40, %v218_v39  ;;  %v138_v46 = vperm.slane %v105_v38, 2  ;;  %v139_v47 = vperm.slane %v105_v38, 6  ;;  %v152_v60 = vperm.slane %v105_v38, 3 }
  0x28   :  { %v116_v49 = vperm.slane %v112_v41, 0  ;;  %v117_v50 = vperm.slane %v113_v42, 0  ;;  %v128_v51 = vperm.slane %v124_v43, 1  ;;  %v129_v52 = vperm.slane %v125_v44, 1 }
  0x29   :  { %374 = vset.pattern.permute.xlu1 %v523_v3  ;;  %v223_v54 = vperm.slane %v221_v45, 0  ;;  %v224_v55 = vperm.slane %v221_v45, 4  ;;  %v142_v56 = vperm.slane %v138_v46, 2  ;;  %v143_v57 = vperm.slane %v139_v47, 2 }
  0x2a   :  { %v231_v58 = vperm.slane %v221_v45, 1  ;;  %v232_v59 = vperm.slane %v221_v45, 5  ;;  %v153_v61 = vperm.slane %v105_v38, 7  ;;  %v241_v4 = vperm.slane %v221_v45, 2 }
  0x2b   :  { %v227_v2 = vperm.slane %v223_v54, 0  ;;  %v228_v3 = vperm.slane %v224_v55, 0  ;;  %v242_v5 = vperm.slane %v221_v45, 6  ;;  %v156_v8 = vperm.slane %v152_v60, 3 }
  0x2c   :  { %v235_v6 = vperm.slane %v231_v58, 1  ;;  %v236_v7 = vperm.slane %v232_v59, 1  ;;  %v157_v9 = vperm.slane %v153_v61, 3  ;;  %v251_v21 = vperm.slane %v221_v45, 3 }
  0x2d   :  { %v286_v54 = vld.sshfl [vmem:[#allocation1] sm:$0xff pattern:$0x75316420]  ;;  %v287_v55 = vld.sshfl [vmem:[#allocation1 + $0x8] sm:$0xff pattern:$0x75316420] }
  0x2e   :  { %v255_v33 = vperm.slane %v251_v21, 3 }
  0x73   :  { %v136_v48 = vpop.permute.xlu2 %135 }
  0x74   :  { %v144_v10 = vmul.f32 %v142_v56, %v136_v48  ;;  %v145_v11 = vmul.f32 %v143_v57, %v136_v48 }
  0x7c   :  { %v150_v14 = vpop.permute.xlu2 %149 }
  0x7d   :  { %v159_v27 = vmul.f32 %v157_v9, %v150_v14  ;;  %v257_v42 = vmul.f32 %v255_v33, %v150_v14 }
  0x8a   :  { %v109_v37 = vpop.permute.xlu1 %108 }
  0x8b   :  { %v118_v62 = vmul.f32 %v116_v49, %v109_v37  ;;  %v119_v63 = vmul.f32 %v117_v50, %v109_v37  ;;  %v229_v15 = vmul.f32 %v227_v2, %v109_v37 }
  0x8f   :  { %v167_v18 = vpop.xlane.xlu0 %166 }
  0x90   :  { %v168_v19 = vadd.f32 %v167_v18, %v92_v16  ;;  %v246_v18 = vperm.slane %v242_v5, 2 }
  0x92   :  { %v171_v20 = vadd.f32 %v170_v17, %v168_v19  ;;  %v245_v17 = vperm.slane %v241_v4, 2  ;;  %v248_v30 = vmul.f32 %v246_v18, %v136_v48 }
  0x93   :  { %v122_v53 = vpop.permute.xlu1 %121 }
  0x94   :  { %174 = vperm.xlu0 %373, %v171_v20   ;;  %v130_v0 = vmul.f32 %v128_v51, %v122_v53  ;;  %v131_v1 = vmul.f32 %v129_v52, %v122_v53  ;;  %v237_v19 = vmul.f32 %v235_v6, %v122_v53  ;;  %v238_v20 = vmul.f32 %v236_v7, %v122_v53 }
  0x95   :  { %v247_v29 = vmul.f32 %v245_v17, %v136_v48 }
  0x96   :  { %v132_v12 = vadd.f32 %v130_v0, %v118_v62  ;;  %v133_v13 = vadd.f32 %v131_v1, %v119_v63  ;;  %v239_v31 = vadd.f32 %v237_v19, %v229_v15 }
  0x97   :  { %v265_v23 = vpop.xlane.xlu0 %264 }
  0x98   :  { %v266_v24 = vadd.f32 %v265_v23, %v92_v16  ;;  %v230_v16 = vmul.f32 %v228_v3, %v109_v37  ;;  %v146_v23 = vadd.f32 %v144_v10, %v132_v12  ;;  %v249_v40 = vadd.f32 %v247_v29, %v239_v31 }
  0x9a   :  { %v269_v25 = vadd.f32 %v268_v22, %v266_v24  ;;  %v252_v22 = vperm.slane %v221_v45, 7  ;;  %v147_v24 = vadd.f32 %v145_v11, %v133_v13  ;;  %v240_v32 = vadd.f32 %v238_v20, %v230_v16 }
  0x9b   :  { %v259_v50 = vadd.f32 %v257_v42, %v249_v40 }
  0x9c   :  { %272 = vperm.xlu1 %374, %v269_v25   ;;  %v158_v25 = vmul.f32 %v156_v8, %v150_v14  ;;  %v161_v35 = vadd.f32 %v159_v27, %v147_v24  ;;  %v256_v36 = vperm.slane %v252_v22, 3  ;;  %v250_v41 = vadd.f32 %v248_v30, %v240_v32 }
  0x9e   :  { %v160_v34 = vadd.f32 %v158_v25, %v146_v23  ;;  %v258_v46 = vmul.f32 %v256_v36, %v150_v14 }
  0xa0   :  { %v260_v51 = vadd.f32 %v258_v46, %v250_v41 }
 0x106   :  { %v175_v38 = vpop.permute.xlu0 %174 }
 0x107   :  { %v177_v37 = vadd.f32 %v175_v38, %v160_v34  ;;  %v178_v39 = vadd.f32 %v175_v38, %v161_v35 }
 0x109   :  { %v181_v43 = vrot.slane %v178_v39, 4  ;;  %v192_v44 = vsub.f32 %v177_v37, %v609_v26  ;;  %v193_v45 = vsub.f32 %v178_v39, %v611_v28 }
 0x10b   :  { %v194_v47 = vmul.f32 %v192_v44, %v192_v44  ;;  %v195_v48 = vmul.f32 %v193_v45, %v193_v45  ;;  %v183_v49 = vsel %vm182_vm1, %v177_v37, %v181_v43 }
 0x10c   :  { %185 = vst [vmem:[#allocation10] sm:$0xff] %v183_v49 }
 0x10d   :  { %v196_v52 = vsel %vm182_vm1, %v194_v47, 0.0  ;;  %v197_v53 = vsel %vm182_vm1, %v195_v48, 0.0 }
 0x10e   :  { %v273_v56 = vpop.permute.xlu1 %272  ;;  %v198_v57 = vadd.f32 %v197_v53, %v196_v52 }
 0x10f   :  { %v275_v58 = vadd.f32 %v273_v56, %v259_v50  ;;  %v276_v26 = vadd.f32 %v273_v56, %v260_v51 }
 0x110   :  { %199 = vadd.xlane.f32.xlu2 %v198_v57 }
 0x111   :  { %v279_v28 = vrot.slane %v276_v26, 4  ;;  %v290_v59 = vsub.f32 %v275_v58, %v286_v54  ;;  %v291_v60 = vsub.f32 %v276_v26, %v287_v55 }
 0x113   :  { %v292_v61 = vmul.f32 %v290_v59, %v290_v59  ;;  %v293_v62 = vmul.f32 %v291_v60, %v291_v60  ;;  %v280_v63 = vsel %vm182_vm1, %v275_v58, %v279_v28 }
 0x114   :  { %283 = vst [vmem:[#allocation10 + $0x8] sm:$0xff] %v280_v63 }
 0x115   :  { %v294_v0 = vsel %vm182_vm1, %v292_v61, 0.0  ;;  %v295_v1 = vsel %vm182_vm1, %v293_v62, 0.0  ;;  %323 = dma.vmem_to_hbm [thread:$0]  %s316_s2, 256, %s318_s19, [#allocation4], %s518_s17, %s518_s17, %s519_s18  }
 0x116   :  { %v296_v2 = vadd.f32 %v295_v1, %v294_v0  ;;  %s528_s17 = smov [#allocation11]  }
 0x117   :  { %s329_s18 = sshll.u32 %s528_s17, 4  ;;  %s330_s18 = int_to_ptr.vmem [resolvable:$true] %s329_s18 }
 0x118   :  { %297 = vadd.xlane.f32.xlu1 %v296_v2 }
 0x183   :  { %v200_v3 = vpop.xlane.xlu2 %199 }
 0x184   :  { %v201_v4 = vrot.slane %v200_v3, 4 }
 0x186   :  { %v202_v5 = vadd.f32 %v201_v4, %v200_v3 }
 0x188   :  { %v203_v6 = vrot.slane %v202_v5, 2 }
 0x18a   :  { %v204_v7 = vadd.f32 %v203_v6, %v202_v5 }
 0x18b   :  { %v298_v8 = vpop.xlane.xlu1 %297 }
 0x18c   :  { %v299_v9 = vrot.slane %v298_v8, 4  ;;  %v205_v10 = vrot.slane %v204_v7, 1 }
 0x18e   :  { %v300_v11 = vadd.f32 %v299_v9, %v298_v8  ;;  %v206_v12 = vadd.f32 %v205_v10, %v204_v7 }
 0x190   :  { %v301_v13 = vrot.slane %v300_v11, 2  ;;  %353 = vpush %v206_v12 }
 0x192   :  { %v302_v14 = vadd.f32 %v301_v13, %v300_v11 }
 0x194   :  { %v303_v15 = vrot.slane %v302_v14, 1 }
 0x196   :  { %v304_v16 = vadd.f32 %v303_v15, %v302_v14 }
 0x198   :  { %355 = vpush %v304_v16 }
 0x1c1   :  { %s354_s8 = spop %353 }
 0x1c2   :  { %v208_v17 = vstv %s354_s8 }
 0x1c9   :  { %s356_s21 = spop %355 }
 0x1ca   :  { %v306_v18 = vstv %s356_s21 }
 0x1cb   :  { %v307_v19 = vadd.f32 %v306_v18, %v208_v17 }
 0x1cd   :  { %v308_v20 = vmul.f32 0.00048828125, %v307_v19 }
 0x1cf   :  { %310 = vst.msk [vmem:[#allocation11] sm:$0x1] %vm309_vm2, %v308_v20 }
 0x1d0   :  { %334 = dma.vmem_to_hbm [thread:$0]  %s330_s18, 16, %s332_s24, [#allocation12]  }
 0x1d1   :  { %513 = dma.done.wait [#allocation4], 256  }
 0x1d2   :  { %514 = vsyncadd [#allocation4], 4294967040 }
 0x1d3   :  { %515 = dma.done.wait [#allocation12], 16  }
 0x1d4   :  { %516 = vsyncadd [#allocation12], 4294967280 }
 0x1d5   :  { %343 = vsyncpa [#allocation3], 1 }
 0x1d6   :  { %344 = vsyncpa [#allocation8], 1 }
 0x1d7   :  { %345 = vsyncpa [#allocation4], 1 }
 0x1d8   :  { %346 = vsyncpa [#allocation12], 1 }
 0x1d9   :  { %347 = vsyncpa [#allocation5], 1 }

</bundles_post_ra>
